<compile_context>
chip_gen: v6e
topology: v6e:2x2x1
jax: 0.10.0
libtpu: 0.0.40
codegen_flags: <defaults>
</compile_context>

<pallas_src>
import jax
import jax.numpy as jnp
from jax import lax
from jax.experimental import pallas as pl
from jax.experimental.pallas import tpu as pltpu


# ----------------------------------------------------------------------------
# Pallas kernels
# ----------------------------------------------------------------------------
def _proj1_kernel(x_ref, w_ref, b_ref, o_ref):
    # gates_x for both directions of layer 0: (T*B, E) @ (E, 8H) + (1, 8H)
    o_ref[...] = (jnp.dot(x_ref[...], w_ref[...],
                          preferred_element_type=jnp.float32) + b_ref[...])


def input_projection(x2d, w_t, b):
    M, E = x2d.shape
    N = w_t.shape[1]
    return pl.pallas_call(
        _proj1_kernel,
        out_shape=jax.ShapeDtypeStruct((M, N), jnp.float32),
        grid=(1,),
        in_specs=[pl.BlockSpec((M, E), lambda i: (0, 0)),
                  pl.BlockSpec((E, N), lambda i: (0, 0)),
                  pl.BlockSpec((1, N), lambda i: (0, 0))],
        out_specs=pl.BlockSpec((M, N), lambda i: (0, 0)),
    )(x2d, w_t, b)


def _proj2_kernel(xa_ref, xb_ref, wa_ref, wb_ref, b_ref, o_ref):
    # gates_x for layers >= 1: input is the previous layer's (fwd, bwd) halves.
    # Splitting W along its input dim avoids concatenating activations in HBM.
    o_ref[...] = (jnp.dot(xa_ref[...], wa_ref[...],
                          preferred_element_type=jnp.float32)
                  + jnp.dot(xb_ref[...], wb_ref[...],
                            preferred_element_type=jnp.float32)
                  + b_ref[...])


def input_projection2(xa, xb, wa_t, wb_t, b):
    M, H = xa.shape
    N = wa_t.shape[1]
    return pl.pallas_call(
        _proj2_kernel,
        out_shape=jax.ShapeDtypeStruct((M, N), jnp.float32),
        grid=(1,),
        in_specs=[pl.BlockSpec((M, H), lambda i: (0, 0)),
                  pl.BlockSpec((M, H), lambda i: (0, 0)),
                  pl.BlockSpec((H, N), lambda i: (0, 0)),
                  pl.BlockSpec((H, N), lambda i: (0, 0)),
                  pl.BlockSpec((1, N), lambda i: (0, 0))],
        out_specs=pl.BlockSpec((M, N), lambda i: (0, 0)),
    )(xa, xb, wa_t, wb_t, b)


def _make_bidir_lstm_kernel(Tc, H):
    """Fused fwd+bwd recurrence of one bidirectional layer.

    Grid = (direction, time_chunk).  gates_x (with bias folded in) is streamed in
    original time order; the backward direction walks its chunk in reverse.
    """

    def kernel(lens_ref, gx_ref, h0_ref, c0_ref, whh_ref,
               out_ref, hn_ref, h_sc, c_sc):
        d = pl.program_id(0)            # 0 = forward, 1 = backward
        tc = pl.program_id(1)
        nT = pl.num_programs(1)

        @pl.when(tc == 0)
        def _():
            h_sc[...] = h0_ref[...]
            c_sc[...] = c0_ref[...]

        whh = whh_ref[...]              # (H, 4H), resident
        lens = lens_ref[...]            # (B, 1) int32

        # First original-time row covered by this (direction, chunk) block.
        base = (tc + d * (nT - 1 - 2 * tc)) * Tc

        def step(s, carry):
            h, c = carry
            # Row inside the chunk in original time order (reversed for bwd).
            local = s + d * (Tc - 1 - 2 * s)
            t_act = base + local

            gates = gx_ref[local] + jnp.dot(h, whh,
                                            preferred_element_type=jnp.float32)
            # PyTorch gate order: i, f, g, o
            i_g = jax.nn.sigmoid(gates[:, 0 * H:1 * H])
            f_g = jax.nn.sigmoid(gates[:, 1 * H:2 * H])
            g_g = jnp.tanh(gates[:, 2 * H:3 * H])
            o_g = jax.nn.sigmoid(gates[:, 3 * H:4 * H])

            c_new = f_g * c + i_g * g_g
            h_new = o_g * jnp.tanh(c_new)

            # packed-sequence semantics: no state update past a sequence's length
            upd = t_act < lens                      # (B, 1) bool -> vsel
            h = jnp.where(upd, h_new, h)
            c = jnp.where(upd, c_new, c)

            out_ref[pl.ds(local, 1)] = h[None]
            return h, c

        h, c = lax.fori_loop(0, Tc, step, (h_sc[...], c_sc[...]), unroll=True)
        h_sc[...] = h
        c_sc[...] = c

        @pl.when(tc == nT - 1)
        def _():
            hn_ref[...] = h             # final hidden of this direction

    return kernel


def lstm_bidir_layer(gx, lens, h0, c0, whh_t, Tc):
    """gx: (2, T, B, 4H) f32 (bias folded in).  Returns:
         out: (2, T, B, H)  per-direction, per-step hidden states
         hn : (2, B, H)     final hidden state of each direction
    """
    _, T, B, G = gx.shape
    H = G // 4
    nT = T // Tc

    def dir_time_map(d, tc):
        # forward: block tc ; backward: block nT-1-tc (original time order)
        return (d, tc + d * (nT - 1 - 2 * tc), 0, 0)

    def dir_map(d, tc):
        return (d, 0, 0)

    out, hn = pl.pallas_call(
        _make_bidir_lstm_kernel(Tc, H),
        out_shape=(jax.ShapeDtypeStruct((2, T, B, H), jnp.float32),
                   jax.ShapeDtypeStruct((2, B, H), jnp.float32)),
        grid_spec=pltpu.PrefetchScalarGridSpec(
            num_scalar_prefetch=0,
            grid=(2, nT),
            in_specs=[
                pl.BlockSpec((B, 1), lambda d, tc: (0, 0)),          # lengths
                pl.BlockSpec((None, Tc, B, G), dir_time_map),        # gates_x chunk
                pl.BlockSpec((None, B, H), dir_map),                 # h0 (per dir)
                pl.BlockSpec((None, B, H), dir_map),                 # c0 (per dir)
                pl.BlockSpec((None, H, G), dir_map),                 # W_hh^T (per dir)
            ],
            out_specs=[
                pl.BlockSpec((None, Tc, B, H), dir_time_map),        # per-step outputs
                pl.BlockSpec((None, B, H), dir_map),                 # final hn
            ],
            scratch_shapes=[pltpu.VMEM((B, H), jnp.float32),         # h carry
                            pltpu.VMEM((B, H), jnp.float32)],        # c carry
        ),
        compiler_params=pltpu.CompilerParams(
            # direction axis is independent -> v7x runs fwd/bwd on its 2 TensorCores;
            # time axis carries the recurrence -> arbitrary (in-order).
            dimension_semantics=("parallel", "arbitrary")),
    )(lens, gx, h0, c0, whh_t)
    return out, hn


# ----------------------------------------------------------------------------
# Parameters (deterministic, PyTorch-like uniform init)
# ----------------------------------------------------------------------------
def init_params(key, vocab_size, E, H, num_layers, O, pad_idx):
    keys = iter(jax.random.split(key, 1 + num_layers * 8 + 2))
    k = float(H) ** -0.5

    emb = jax.random.normal(next(keys), (vocab_size, E), jnp.float32)
    emb = emb.at[pad_idx].set(0.0)          # nn.Embedding padding_idx row

    layers = []
    for l in range(num_layers):
        in_dim = E if l == 0 else 2 * H
        wih, whh, b = [], [], []
        for _d in range(2):                 # fwd, bwd
            wih.append(jax.random.uniform(next(keys), (in_dim, 4 * H),
                                          minval=-k, maxval=k))
            whh.append(jax.random.uniform(next(keys), (H, 4 * H),
                                          minval=-k, maxval=k))
            bih = jax.random.uniform(next(keys), (1, 4 * H), minval=-k, maxval=k)
            bhh = jax.random.uniform(next(keys), (1, 4 * H), minval=-k, maxval=k)
            b.append(bih + bhh)             # pre-summed biases
        layers.append({
            "wih_cat_t": jnp.concatenate(wih, axis=1).astype(jnp.float32),  # (in, 8H)
            "b_cat": jnp.concatenate(b, axis=1).astype(jnp.float32),        # (1, 8H)
            "whh_t": jnp.stack(whh, axis=0).astype(jnp.float32),            # (2, H, 4H)
        })

    out_w_t = jax.random.uniform(next(keys), (H, O), minval=-k,
                                 maxval=k).astype(jnp.float32)
    out_b = jax.random.uniform(next(keys), (1, O), minval=-k,
                               maxval=k).astype(jnp.float32)
    return {"emb": emb, "lstm": layers, "out_w_t": out_w_t, "out_b": out_b}


# ----------------------------------------------------------------------------
# Forward pass (mirrors LSTMClassifier.forward, eval mode)
# ----------------------------------------------------------------------------
def lstm_classifier_forward(params, text, h0_all, c0_all, pad_idx=1,
                            time_chunk=8):
    # text: (B, T) int32 token ids (batch-first, like PyTorch)
    B, T = text.shape
    H = params["lstm"][0]["whh_t"].shape[1]

    lens = jnp.sum((text != pad_idx).astype(jnp.int32), axis=1)      # (B,)

    # Pad batch to a multiple of 8 sublanes and time to a multiple of the chunk.
    # Padded rows get length 0 (never updated); padded steps are masked out.
    B_pad = ((B + 7) // 8) * 8
    Tc = time_chunk
    T_pad = ((T + Tc - 1) // Tc) * Tc

    # Embedding lookup is a gather -> plain JAX glue.
    emb = jnp.take(params["emb"], text, axis=0).astype(jnp.float32)  # (B, T, E)
    x = jnp.transpose(emb, (1, 0, 2))                                # (T, B, E)
    x = jnp.pad(x, ((0, T_pad - T), (0, B_pad - B), (0, 0)))
    lens_p = jnp.pad(lens, (0, B_pad - B)).reshape(B_pad, 1).astype(jnp.int32)
    h0p = jnp.pad(h0_all, ((0, 0), (0, B_pad - B), (0, 0))).astype(jnp.float32)
    c0p = jnp.pad(c0_all, ((0, 0), (0, B_pad - B), (0, 0))).astype(jnp.float32)

    M = T_pad * B_pad
    layer_out = None
    hn_last_bwd = None
    for l, layer in enumerate(params["lstm"]):
        # Hoisted input projection: one big MXU matmul over all T*B rows,
        # both directions fused -> (M, 8H) gate stream with bias folded in.
        if l == 0:
            gx_flat = input_projection(x.reshape(M, x.shape[-1]),
                                       layer["wih_cat_t"], layer["b_cat"])
        else:
            wa_t = layer["wih_cat_t"][:H]       # weights for previous fwd half
            wb_t = layer["wih_cat_t"][H:]       # weights for previous bwd half
            gx_flat = input_projection2(layer_out[0].reshape(M, H),
                                        layer_out[1].reshape(M, H),
                                        wa_t, wb_t, layer["b_cat"])
        gx = gx_flat.reshape(T_pad, B_pad, 2, 4 * H).transpose(2, 0, 1, 3)

        layer_out, hn = lstm_bidir_layer(gx, lens_p,
                                         h0p[2 * l:2 * l + 2],
                                         c0p[2 * l:2 * l + 2],
                                         layer["whh_t"], Tc)
        hn_last_bwd = hn[1, :B]                 # hn of backward direction

    # hn[-1] == final hidden of the backward direction of the last layer.
    # TODO(synk): nn.Dropout is identity in eval mode; training-mode dropout not applied.
    # Tiny (B,H)@(H,O) head left to XLA: a separate pallas_call is pure launch overhead.
    logits = hn_last_bwd @ params["out_w_t"] + params["out_b"]
    return logits


# ----------------------------------------------------------------------------
if __name__ == "__main__":
    vocab_size, E, H, num_layers, O = 50, 16, 32, 2, 4
    B, T = 2, 8
    pad_idx = 1

    key = jax.random.PRNGKey(0)
    k_param, k_text, k_h, k_c = jax.random.split(key, 4)

    params = init_params(k_param, vocab_size, E, H, num_layers, O, pad_idx)

    # text with sorted-descending lengths (pack_padded_sequence default)
    seq_lens = jnp.array([8, 5], dtype=jnp.int32)
    tokens = jax.random.randint(k_text, (B, T), 2, vocab_size, dtype=jnp.int32)
    pos = jnp.arange(T, dtype=jnp.int32)[None, :]
    text = jnp.where(pos < seq_lens[:, None], tokens, pad_idx).astype(jnp.int32)

    # init_hidden: torch.randn -> deterministic normal here
    h0 = jax.random.normal(k_h, (num_layers * 2, B, H), jnp.float32)
    c0 = jax.random.normal(k_c, (num_layers * 2, B, H), jnp.float32)

    out = lstm_classifier_forward(params, text, h0, c0, pad_idx)
    jax.block_until_ready(out)
    assert out.shape == (B, O) and out.dtype == jnp.float32
    print("KERNEL_OK")
</pallas_src>

<mosaic_0001>
module attributes {stable_mosaic.version = 11 : i64} {
  func.func @_proj1_kernel(%arg0: i32, %arg1: memref<64x16xf32, #tpu.memory_space<vmem>>, %arg2: memref<16x256xf32, #tpu.memory_space<vmem>>, %arg3: memref<1x256xf32, #tpu.memory_space<vmem>>, %arg4: memref<64x256xf32, #tpu.memory_space<vmem>>) attributes {dimension_semantics = [#tpu.dimension_semantics<arbitrary>], iteration_bounds = array<i64: 1>, scalar_prefetch = 0 : i64, scratch_operands = 0 : i64, tpu.core_type = #tpu.core_type<tc>, window_params = [{pipeline_mode = #tpu.pipeline_mode<synchronous>, transform_indices = @transform_0, window_bounds = array<i64: 64, 16>}, {pipeline_mode = #tpu.pipeline_mode<synchronous>, transform_indices = @transform_1, window_bounds = array<i64: 16, 256>}, {pipeline_mode = #tpu.pipeline_mode<synchronous>, transform_indices = @transform_2, window_bounds = array<i64: 1, 256>}, {pipeline_mode = #tpu.pipeline_mode<synchronous>, transform_indices = @transform_3, window_bounds = array<i64: 64, 256>}]} {
    %c0 = arith.constant 0 : index
    %c0_0 = arith.constant 0 : index
    %0 = vector.load %arg1[%c0, %c0_0] : memref<64x16xf32, #tpu.memory_space<vmem>>, vector<64x16xf32>
    %c0_1 = arith.constant 0 : index
    %c0_2 = arith.constant 0 : index
    %1 = vector.load %arg2[%c0_1, %c0_2] : memref<16x256xf32, #tpu.memory_space<vmem>>, vector<16x256xf32>
    %cst = arith.constant dense<0.000000e+00> : vector<64x256xf32>
    %2 = tpu.matmul %0, %1, %cst {dimension_numbers = #tpu.dot_dimension_numbers<[1], [0], [0], [1], [0, 0, 1, 1], [], []>} : vector<64x16xf32>, vector<16x256xf32>, vector<64x256xf32> -> vector<64x256xf32>
    %c0_3 = arith.constant 0 : index
    %c0_4 = arith.constant 0 : index
    %3 = vector.load %arg3[%c0_3, %c0_4] : memref<1x256xf32, #tpu.memory_space<vmem>>, vector<1x256xf32>
    %4 = vector.broadcast %3 : vector<1x256xf32> to vector<64x256xf32>
    %5 = arith.addf %2, %4 : vector<64x256xf32>
    %c0_5 = arith.constant 0 : index
    %c0_6 = arith.constant 0 : index
    %6 = vector.load %arg4[%c0_5, %c0_6] : memref<64x256xf32, #tpu.memory_space<vmem>>, vector<64x256xf32>
    tpu.vector_store %arg4[%c0_5, %c0_6], %5 {strides = array<i32>} : memref<64x256xf32, #tpu.memory_space<vmem>>, vector<64x256xf32>,
    return
  }
  func.func @transform_0(%arg0: i32) -> (i32, i32) {
    %c0_i32 = arith.constant 0 : i32
    %c0_i32_0 = arith.constant 0 : i32
    %c0_i32_1 = arith.constant 0 : i32
    return %c0_i32, %c0_i32_0 : i32, i32
  }
  func.func @transform_1(%arg0: i32) -> (i32, i32) {
    %c0_i32 = arith.constant 0 : i32
    %c0_i32_0 = arith.constant 0 : i32
    %c0_i32_1 = arith.constant 0 : i32
    return %c0_i32, %c0_i32_0 : i32, i32
  }
  func.func @transform_2(%arg0: i32) -> (i32, i32) {
    %c0_i32 = arith.constant 0 : i32
    %c0_i32_0 = arith.constant 0 : i32
    %c0_i32_1 = arith.constant 0 : i32
    return %c0_i32, %c0_i32_0 : i32, i32
  }
  func.func @transform_3(%arg0: i32) -> (i32, i32) {
    %c0_i32 = arith.constant 0 : i32
    %c0_i32_0 = arith.constant 0 : i32
    %c0_i32_1 = arith.constant 0 : i32
    return %c0_i32, %c0_i32_0 : i32, i32
  }
}

</mosaic_0001>

<bundles_post_ra>
// kernel: tpu_custom_call.1
= control target key start
LH: loop header
LB: loop body
LE: loop exit
PB: predicated region body
PF: predicated region fallthrough
CT: control target
= control target key end

     0   :  { %vm39_vm0 = vcmask 130048   ;;  %s321_s0 = inlined_call_operand.vmem [shape: f32[64,16], index: 0, kind: input, shape index: {}]   ;;  %s322_s1 = inlined_call_operand.vmem [shape: f32[16,256], index: 1, kind: input, shape index: {}]   ;;  %s323_s2 = inlined_call_operand.vmem [shape: f32[1,256], index: 2, kind: input, shape index: {}]   ;;  %s324_s3 = inlined_call_operand.hbm [shape: f32[64,256], index: 3, kind: output, shape index: {}]  }
   0x1   :  { %v26_v0 = vld [vmem:[%s322_s1 + $0x18] sm:$0xff]  ;;  %v25_v1 = vld [vmem:[%s322_s1 + $0x10] sm:$0xff]  ;;  %v24_v2 = vld [vmem:[%s322_s1 + $0x8] sm:$0xff] }
   0x2   :  { %92 = vmatprep.subr.mxu0 %v26_v0  ;;  %217 = vmatprep.subr.mxu1 %v26_v0  ;;  %v23_v3 = vld [vmem:[%s322_s1] sm:$0xff] }
   0x3   :  { %93 = vmatpush1.msra.mxu0 %v25_v1  ;;  %219 = vmatpush1.msra.mxu1 %v25_v1  ;;  %v15_v4 = vld [vmem:[%s321_s0] sm:$0xff] }
   0x4   :  { %94 = vmatprep.subr.mxu0 %v24_v2  ;;  %218 = vmatprep.subr.mxu1 %v24_v2  ;;  %v19_v5 = vld [vmem:[%s321_s0 + $0x20] sm:$0xff] }
   0x5   :  { %95 = vmatpush1.msra.mxu0 %v23_v3  ;;  %220 = vmatpush1.msra.mxu1 %v23_v3 }
   0x6   :  { %8 = vsyncpa [#allocation3], 0  ;;  %v247_v6 = vmov 0.0   ;;  %v16_v7 = vld [vmem:[%s321_s0 + $0x8] sm:$0xff]  ;;  %v17_v9 = vld [vmem:[%s321_s0 + $0x10] sm:$0xff]  ;;  %v29_v13 = vlaneseq }
   0x7   :  { %128 = vmatprep.mubr.f32.mxu0 %v247_v6  ;;  %152 = vmatprep.mubr.f32.mxu1 %v247_v6  ;;  %v20_v8 = vld [vmem:[%s321_s0 + $0x28] sm:$0xff]  ;;  %v21_v10 = vld [vmem:[%s321_s0 + $0x30] sm:$0xff]  ;;  %v18_v11 = vld [vmem:[%s321_s0 + $0x18] sm:$0xff] }
   0x8   :  { %209 = vmatmul.mubr.msk.f32.vlgmr.msra.gmra.mxu0 %vm39_vm0, %v15_v4  ;;  %213 = vmatmul.mubr.msk.f32.vlgmr.msra.gmra.mxu1 %vm39_vm0, %v19_v5  ;;  %v22_v12 = vld [vmem:[%s321_s0 + $0x38] sm:$0xff]  ;;  %v30_v14 = vshrl.u32 %v29_v13, 7  ;;  %v27_v16 = vld [vmem:[%s323_s2] sm:$0x3]  ;;  %s248_s0 = smov [#allocation2]  }
   0x9   :  { %134 = vmatprep.mubr.f32.mxu0 %v247_v6  ;;  %158 = vmatprep.mubr.f32.mxu1 %v247_v6  ;;  %s198_s2 = sshll.u32 %s248_s0, 4  ;;  %s199_s2 = int_to_ptr.vmem [resolvable:$true] %s198_s2 }
   0xa   :  { %v31_v15 = vsub.s32 0, %v30_v14  ;;  %v35_v17 = vsub.s32 1, %v30_v14  ;;  %s225_s10 = scalar_lea.vmem %s199_s2, 2048  ;;  %p230_p1 = scmp.lt.s32.totalorder %s199_s2, %s199_s2 }
   0xb   :  { %p226_p0 = scmp.ne.s32.totalorder %s199_s2, %s225_s10  ;;  %p231_p2 = scmp.lt.s32.totalorder %s225_s10, %s225_s10 }
   0xc   :  { %210 = vmatmul.mubr.msk.f32.gmra.mxu0 %vm39_vm0, %v16_v7  ;;  %214 = vmatmul.mubr.msk.f32.gmra.mxu1 %vm39_vm0, %v20_v8  ;;  %v32_v18 = vrot.slane %v27_v16, %v31_v15  ;;  %v36_v19 = vrot.slane %v27_v16, %v35_v17 }
   0xd   :  { %140 = vmatprep.mubr.f32.mxu0 %v247_v6  ;;  %164 = vmatprep.mubr.f32.mxu1 %v247_v6  ;;  %p232_p3 = por %p231_p2, %p230_p1 }
   0xf   :  { %p233_p4 = pnand %p232_p3, %p226_p0 }
  0x10   :  { %211 = vmatmul.mubr.msk.f32.gmra.mxu0 %vm39_vm0, %v17_v9  ;;  %215 = vmatmul.mubr.msk.f32.gmra.mxu1 %vm39_vm0, %v21_v10 }
  0x11   :  { %146 = vmatprep.mubr.f32.mxu0 %v247_v6  ;;  %170 = vmatprep.mubr.f32.mxu1 %v247_v6 }
  0x14   :  { %212 = vmatmul.mubr.msk.f32.gmra.mxu0 %vm39_vm0, %v18_v11  ;;  %216 = vmatmul.mubr.msk.f32.gmra.mxu1 %vm39_vm0, %v22_v12 }
  0xc8   :  { %v130_v20 = vpop.f32.mrf.mxu0  ;;  %v154_v21 = vpop.f32.mrf.mxu1 }
  0xc9   :  { %v131_v22 = vadd.f32 %v130_v20, %v32_v18  ;;  %v155_v23 = vadd.f32 %v154_v21, %v32_v18 }
  0xca   :  { %v132_v24 = vpop.f32.mrf.mxu0  ;;  %v156_v25 = vpop.f32.mrf.mxu1 }
  0xcb   :  { %177 = vst [vmem:[#allocation2] sm:$0xff] %v131_v22  ;;  %185 = vst [vmem:[#allocation2 + $0x40] sm:$0xff] %v155_v23  ;;  %v133_v26 = vadd.f32 %v132_v24, %v36_v19  ;;  %v157_v27 = vadd.f32 %v156_v25, %v36_v19 }
  0xcc   :  { %v136_v28 = vpop.f32.mrf.mxu0  ;;  %v160_v29 = vpop.f32.mrf.mxu1 }
  0xcd   :  { %178 = vst [vmem:[#allocation2 + $0x8] sm:$0xff] %v133_v26  ;;  %186 = vst [vmem:[#allocation2 + $0x48] sm:$0xff] %v157_v27  ;;  %v137_v30 = vadd.f32 %v136_v28, %v32_v18  ;;  %v161_v31 = vadd.f32 %v160_v29, %v32_v18 }
  0xce   :  { %v138_v32 = vpop.f32.mrf.mxu0  ;;  %v162_v33 = vpop.f32.mrf.mxu1 }
  0xcf   :  { %179 = vst [vmem:[#allocation2 + $0x10] sm:$0xff] %v137_v30  ;;  %187 = vst [vmem:[#allocation2 + $0x50] sm:$0xff] %v161_v31  ;;  %v139_v34 = vadd.f32 %v138_v32, %v36_v19  ;;  %v163_v35 = vadd.f32 %v162_v33, %v36_v19 }
  0xd0   :  { %v142_v36 = vpop.f32.mrf.mxu0  ;;  %v166_v37 = vpop.f32.mrf.mxu1 }
  0xd1   :  { %180 = vst [vmem:[#allocation2 + $0x18] sm:$0xff] %v139_v34  ;;  %188 = vst [vmem:[#allocation2 + $0x58] sm:$0xff] %v163_v35  ;;  %v143_v38 = vadd.f32 %v142_v36, %v32_v18  ;;  %v167_v39 = vadd.f32 %v166_v37, %v32_v18 }
  0xd2   :  { %v144_v40 = vpop.f32.mrf.mxu0  ;;  %v168_v41 = vpop.f32.mrf.mxu1 }
  0xd3   :  { %181 = vst [vmem:[#allocation2 + $0x20] sm:$0xff] %v143_v38  ;;  %189 = vst [vmem:[#allocation2 + $0x60] sm:$0xff] %v167_v39  ;;  %v145_v42 = vadd.f32 %v144_v40, %v36_v19  ;;  %v169_v43 = vadd.f32 %v168_v41, %v36_v19 }
  0xd4   :  { %v148_v44 = vpop.f32.mrf.mxu0  ;;  %v172_v45 = vpop.f32.mrf.mxu1 }
  0xd5   :  { %182 = vst [vmem:[#allocation2 + $0x28] sm:$0xff] %v145_v42  ;;  %190 = vst [vmem:[#allocation2 + $0x68] sm:$0xff] %v169_v43  ;;  %v149_v46 = vadd.f32 %v148_v44, %v32_v18  ;;  %v173_v47 = vadd.f32 %v172_v45, %v32_v18 }
  0xd6   :  { %v150_v48 = vpop.f32.mrf.mxu0  ;;  %v174_v49 = vpop.f32.mrf.mxu1 }
  0xd7   :  { %183 = vst [vmem:[#allocation2 + $0x30] sm:$0xff] %v149_v46  ;;  %191 = vst [vmem:[#allocation2 + $0x70] sm:$0xff] %v173_v47  ;;  %v151_v50 = vadd.f32 %v150_v48, %v36_v19  ;;  %v175_v51 = vadd.f32 %v174_v49, %v36_v19 }
  0xd9   :  { %184 = vst [vmem:[#allocation2 + $0x38] sm:$0xff] %v151_v50  ;;  %192 = vst [vmem:[#allocation2 + $0x78] sm:$0xff] %v175_v51 }
  0xda   :  { %236 = shalt.err (!%p233_p4)
}
  0xdb   :  { %s249_s11 = smov 256   ;;  %s250_s12 = smov 16  }
  0xdc   :  { %204 = dma.vmem_to_hbm [thread:$0]  %s199_s2, 2048, %s324_s3, [#allocation3], %s249_s11, %s249_s11, %s250_s12  }
  0xdd   :  { %245 = dma.done.wait [#allocation3], 2048  }
  0xde   :  { %246 = vsyncadd [#allocation3], 4294965248 }
  0xdf   :  { %208 = vsyncpa [#allocation3], 1 }

</bundles_post_ra>
